<compile_context>
chip_gen: v7x
topology: tpu7x:2x2x1
jax: 0.10.0
libtpu: 0.0.40
codegen_flags: <defaults>
</compile_context>

<pallas_src>
import functools

import jax
import jax.numpy as jnp
from jax import lax
from jax.experimental import pallas as pl
from jax.experimental.pallas import tpu as pltpu

EPS = 1e-5


# ------------------------------- small helpers --------------------------------
def _round_up(x, m):
    return ((x + m - 1) // m) * m


def _pad_cout(cout):
    # Keep Cout as-is when it is a multiple of 64 (half-vreg; masked stores are cheap and
    # padding would double MXU-N work and stash bytes); otherwise round up to a multiple
    # of 128 so stores stay lane-dense.
    return cout if cout % 64 == 0 else _round_up(cout, 128)


def _vmem_limit_bytes():
    # Generation-aware scoped-VMEM cap: ~3/4 of physical VMEM (v5e/v6e 128 MiB -> 96 MiB,
    # v7x 64 MiB -> 48 MiB); falls back to 32 MiB if the query is unavailable.
    try:
        cap = int(pltpu.get_tpu_info().vmem_capacity_bytes)
        return max(min(cap * 3 // 4, 96 * 1024 * 1024), 32 * 1024 * 1024)
    except Exception:
        return 32 * 1024 * 1024


def _cparams():
    return pltpu.CompilerParams(
        dimension_semantics=("parallel",),        # per-image grid; megacore can split it
        vmem_limit_bytes=_vmem_limit_bytes(),
    )


# -------- pass A1: stride-1 3x3 conv, taps built in-kernel (no im2col in HBM) --------
def _conv3x3_s1_kernel(xp_ref, w_ref, y_ref, ps_ref, pss_ref):
    _, hp, wp, cin = xp_ref.shape
    ho, wo = hp - 2, wp - 2
    cp = y_ref.shape[-1]
    # Unpack to 32-bit once so the unaligned window slices use the mature f32 relayout path.
    xp = xp_ref[0].astype(jnp.float32)               # (hp, wp, cin)
    acc = jnp.zeros((ho * wo, cp), jnp.float32)
    for ky in range(3):                              # 9 accumulating MXU matmuls, K = Cin
        for kx in range(3):
            tap = xp[ky:ky + ho, kx:kx + wo, :].reshape(ho * wo, cin).astype(jnp.bfloat16)
            acc = acc + jnp.dot(tap, w_ref[ky * 3 + kx],
                                preferred_element_type=jnp.float32)
    y_ref[0] = acc.astype(y_ref.dtype)               # bf16 pre-BN stash
    ps_ref[0] = jnp.sum(acc, axis=0, keepdims=True)  # per-image partial stats (f32)
    pss_ref[0] = jnp.sum(acc * acc, axis=0, keepdims=True)


# ------ pass A2: matmul over wrapper-built taps (stride!=1 conv1 / 1x1 shortcut stats) ------
def _taps_matmul_kernel(*refs, emit_y):
    if emit_y:
        taps_ref, w_ref, y_ref, ps_ref, pss_ref = refs
    else:
        taps_ref, w_ref, ps_ref, pss_ref = refs
    acc = jnp.dot(taps_ref[0], w_ref[...], preferred_element_type=jnp.float32)
    if emit_y:
        y_ref[0] = acc.astype(y_ref.dtype)
    ps_ref[0] = jnp.sum(acc, axis=0, keepdims=True)
    pss_ref[0] = jnp.sum(acc * acc, axis=0, keepdims=True)


# ---- pass B: y * scale + shift (+ residual / recomputed 1x1 shortcut BN) (+ ReLU) ----
def _finalize_kernel(*refs, mode, apply_relu):
    if mode == "project":
        y_ref, sc_ref, sh_ref, t_ref, w_ref, rsc_ref, rsh_ref, o_ref = refs
    elif mode == "identity":
        y_ref, sc_ref, sh_ref, r_ref, o_ref = refs
    else:
        y_ref, sc_ref, sh_ref, o_ref = refs

    out = y_ref[0].astype(jnp.float32) * sc_ref[...] + sh_ref[...]
    if mode == "identity":
        out = out + r_ref[0].astype(jnp.float32)
    elif mode == "project":
        # Recompute the 1x1 shortcut on the otherwise-idle MXU instead of stashing it in HBM.
        ysc = jnp.dot(t_ref[0], w_ref[...], preferred_element_type=jnp.float32)
        out = out + ysc * rsc_ref[...] + rsh_ref[...]
    if apply_relu:
        out = jnp.maximum(out, 0.0)
    o_ref[0] = out.astype(o_ref.dtype)


# ------------------------------ pallas_call wrappers ---------------------------
def conv3x3_s1_pallas(xp, w9, cp):
    n, hp, wp, cin = xp.shape
    ho, wo = hp - 2, wp - 2
    m_img = ho * wo
    stats = jax.ShapeDtypeStruct((n, 1, cp), jnp.float32)
    stats_spec = pl.BlockSpec((1, 1, cp), lambda i: (i, 0, 0))
    return pl.pallas_call(
        _conv3x3_s1_kernel,
        out_shape=(jax.ShapeDtypeStruct((n, m_img, cp), jnp.bfloat16), stats, stats),
        grid=(n,),
        in_specs=[
            pl.BlockSpec((1, hp, wp, cin), lambda i: (i, 0, 0, 0)),
            pl.BlockSpec((9, cin, cp), lambda i: (0, 0, 0)),
        ],
        out_specs=(pl.BlockSpec((1, m_img, cp), lambda i: (i, 0, 0)), stats_spec, stats_spec),
        compiler_params=_cparams(),
    )(xp, w9)


def taps_matmul_pallas(taps, w, cp, emit_y):
    n, m_img, k = taps.shape
    stats = jax.ShapeDtypeStruct((n, 1, cp), jnp.float32)
    stats_spec = pl.BlockSpec((1, 1, cp), lambda i: (i, 0, 0))
    y_shape = jax.ShapeDtypeStruct((n, m_img, cp), jnp.bfloat16)
    y_spec = pl.BlockSpec((1, m_img, cp), lambda i: (i, 0, 0))
    out_shape = (y_shape, stats, stats) if emit_y else (stats, stats)
    out_specs = (y_spec, stats_spec, stats_spec) if emit_y else (stats_spec, stats_spec)
    return pl.pallas_call(
        functools.partial(_taps_matmul_kernel, emit_y=emit_y),
        out_shape=out_shape,
        grid=(n,),
        in_specs=[
            pl.BlockSpec((1, m_img, k), lambda i: (i, 0, 0)),
            pl.BlockSpec((k, cp), lambda i: (0, 0)),
        ],
        out_specs=out_specs,
        compiler_params=_cparams(),
    )(taps, w)


def bn_finalize_pallas(y, scale, shift, out_dtype, apply_relu,
                       residual=None, sc_taps=None, sc_w=None, sc_scale=None, sc_shift=None):
    n, m_img, cp = y.shape
    tile = pl.BlockSpec((1, m_img, cp), lambda i: (i, 0, 0))
    vec = pl.BlockSpec((1, cp), lambda i: (0, 0))
    inputs, specs = [y, scale, shift], [tile, vec, vec]
    if sc_taps is not None:
        mode = "project"
        k = sc_taps.shape[-1]
        inputs += [sc_taps, sc_w, sc_scale, sc_shift]
        specs += [pl.BlockSpec((1, m_img, k), lambda i: (i, 0, 0)),
                  pl.BlockSpec((k, cp), lambda i: (0, 0)), vec, vec]
    elif residual is not None:
        mode = "identity"
        inputs += [residual]
        specs += [tile]
    else:
        mode = "none"
    return pl.pallas_call(
        functools.partial(_finalize_kernel, mode=mode, apply_relu=apply_relu),
        out_shape=jax.ShapeDtypeStruct((n, m_img, cp), out_dtype),
        grid=(n,),
        in_specs=specs,
        out_specs=tile,
        compiler_params=_cparams(),
    )(*inputs)


# ------------------------------ JAX layout glue --------------------------------
def _w3x3_taps(w_oihw, cp):
    """(Cout,Cin,3,3) -> (9, Cin, Cp) bf16; tap index = ky*3+kx (matches the kernel loop)."""
    cout, cin, kh, kw = w_oihw.shape
    w = jnp.transpose(w_oihw, (2, 3, 1, 0)).reshape(kh * kw, cin, cout)
    return jnp.pad(w, ((0, 0), (0, 0), (0, cp - cout))).astype(jnp.bfloat16)


def _w_mat(w_oihw, cp):
    """(Cout,Cin,kH,kW) -> (kH*kW*Cin, Cp) bf16; row order matches _im2col column order."""
    cout, cin, kh, kw = w_oihw.shape
    w = jnp.transpose(w_oihw, (2, 3, 1, 0)).reshape(kh * kw * cin, cout)
    return jnp.pad(w, ((0, 0), (0, cp - cout))).astype(jnp.bfloat16)


def _im2col(x_nhwc, ksize, stride, padding):
    """Wrapper-side taps (used only for stride!=1 3x3, or as a fallback): (N, Ho*Wo, k*k*C)."""
    n, h, w, c = x_nhwc.shape
    ho = (h + 2 * padding - ksize) // stride + 1
    wo = (w + 2 * padding - ksize) // stride + 1
    xp = jnp.pad(x_nhwc, ((0, 0), (padding, padding), (padding, padding), (0, 0)))
    cols = []
    for ky in range(ksize):
        for kx in range(ksize):
            cols.append(xp[:, ky:ky + stride * (ho - 1) + 1:stride,
                           kx:kx + stride * (wo - 1) + 1:stride, :])
    return jnp.concatenate(cols, axis=-1).reshape(n, ho * wo, ksize * ksize * c)


def _conv3x3_stats(x_nhwc, w_oihw, stride, cp):
    """3x3 pad-1 conv -> (bf16 pre-BN stash, per-image BN partial sums/sumsq)."""
    x = x_nhwc.astype(jnp.bfloat16)
    n, h, w, _ = x.shape
    wo = (w + 2 - 3) // stride + 1
    if stride == 1 and wo % 8 == 0:
        xp = jnp.pad(x, ((0, 0), (1, 1), (1, 1), (0, 0)))
        return conv3x3_s1_pallas(xp, _w3x3_taps(w_oihw, cp), cp)
    # TODO(synk): extend the in-kernel tap gather to strided windows so stride-2 conv1 also
    # avoids this wrapper-built taps tensor (it is 2.25x the input, vs 9x the output before).
    taps = _im2col(x, 3, stride, 1)
    return taps_matmul_pallas(taps, _w_mat(w_oihw, cp), cp, emit_y=True)


def _bn_scale_shift(psum, psumsq, gamma, beta, count, cp):
    """Combine per-image partials (tree-reduced in f32) into per-channel BN scale/shift."""
    s = jnp.sum(psum, axis=(0, 1))
    ss = jnp.sum(psumsq, axis=(0, 1))
    mean = s / count
    var = jnp.maximum(ss / count - mean * mean, 0.0)     # guard against f32 cancellation
    g = jnp.pad(gamma.astype(jnp.float32), (0, cp - gamma.shape[0]))
    b = jnp.pad(beta.astype(jnp.float32), (0, cp - beta.shape[0]))
    scale = g * lax.rsqrt(var + EPS)
    shift = b - mean * scale
    return scale.reshape(1, cp), shift.reshape(1, cp)


def resnet_block_forward(x_nchw, p, stride, out_dtype=jnp.bfloat16):
    x = jnp.transpose(x_nchw, (0, 2, 3, 1))              # NCHW -> NHWC (channels on lanes)
    n, h, w, cin = x.shape
    cout = p["w1"].shape[0]
    cp = _pad_cout(cout)
    ho = (h + 2 - 3) // stride + 1
    wo = (w + 2 - 3) // stride + 1
    m_img = ho * wo
    count = float(n * m_img)

    # ---- conv1 -> bn1 -> relu -------------------------------------------------
    y1, s1, ss1 = _conv3x3_stats(x, p["w1"], stride, cp)
    sc1, sh1 = _bn_scale_shift(s1, ss1, p["g1"], p["b1"], count, cp)
    out1 = bn_finalize_pallas(y1, sc1, sh1, jnp.bfloat16, apply_relu=True)

    # ---- conv2 (stride 1; taps gathered in-kernel from the padded bf16 activation) ----
    out1_img = out1[:, :, :cout].reshape(n, ho, wo, cout)
    y2, s2, ss2 = _conv3x3_stats(out1_img, p["w2"], 1, cp)
    sc2, sh2 = _bn_scale_shift(s2, ss2, p["g2"], p["b2"], count, cp)

    # ---- shortcut + fused bn2 / shortcut-BN / add / relu ----------------------
    if "w_sc" in p:                                       # projection shortcut (1x1, stride s)
        taps_s = x[:, :(ho - 1) * stride + 1:stride,
                   :(wo - 1) * stride + 1:stride, :].reshape(n, m_img, cin).astype(jnp.bfloat16)
        w_sc = _w_mat(p["w_sc"], cp)
        s_s, ss_s = taps_matmul_pallas(taps_s, w_sc, cp, emit_y=False)   # stats only, no stash
        scs, shs = _bn_scale_shift(s_s, ss_s, p["g_sc"], p["b_sc"], count, cp)
        out = bn_finalize_pallas(y2, sc2, sh2, out_dtype, apply_relu=True,
                                 sc_taps=taps_s, sc_w=w_sc, sc_scale=scs, sc_shift=shs)
    else:                                                 # identity shortcut (cin == cout)
        res = jnp.pad(x, ((0, 0), (0, 0), (0, 0), (0, cp - cin)))
        res = res.reshape(n, m_img, cp).astype(jnp.bfloat16)
        out = bn_finalize_pallas(y2, sc2, sh2, out_dtype, apply_relu=True, residual=res)

    out = out[:, :, :cout].reshape(n, ho, wo, cout)
    return jnp.transpose(out, (0, 3, 1, 2))               # NHWC -> NCHW


# ----------------------------- pure-JAX reference -------------------------------
def _conv2d_ref(x, w, stride, padding):
    return lax.conv_general_dilated(
        x, w, (stride, stride), [(padding, padding), (padding, padding)],
        dimension_numbers=("NCHW", "OIHW", "NCHW"),
        precision=lax.Precision.HIGHEST)


def _bn_train_ref(y, gamma, beta):
    mean = jnp.mean(y, axis=(0, 2, 3), keepdims=True)
    var = jnp.mean((y - mean) ** 2, axis=(0, 2, 3), keepdims=True)
    return (y - mean) * lax.rsqrt(var + EPS) * gamma.reshape(1, -1, 1, 1) + beta.reshape(1, -1, 1, 1)


def resnet_block_ref(x, p, stride):
    out = jax.nn.relu(_bn_train_ref(_conv2d_ref(x, p["w1"], stride, 1), p["g1"], p["b1"]))
    out = _bn_train_ref(_conv2d_ref(out, p["w2"], 1, 1), p["g2"], p["b2"])
    if "w_sc" in p:
        sc = _bn_train_ref(_conv2d_ref(x, p["w_sc"], stride, 0), p["g_sc"], p["b_sc"])
    else:
        sc = x
    return jax.nn.relu(out + sc)


# ---------------------------------- params --------------------------------------
def init_params(key, cin, cout, stride):
    ks = jax.random.split(key, 9)
    p = {
        "w1": 0.1 * jax.random.normal(ks[0], (cout, cin, 3, 3), jnp.float32),
        "g1": 1.0 + 0.1 * jax.random.normal(ks[1], (cout,), jnp.float32),
        "b1": 0.05 * jax.random.normal(ks[2], (cout,), jnp.float32),
        "w2": 0.1 * jax.random.normal(ks[3], (cout, cout, 3, 3), jnp.float32),
        "g2": 1.0 + 0.1 * jax.random.normal(ks[4], (cout,), jnp.float32),
        "b2": 0.05 * jax.random.normal(ks[5], (cout,), jnp.float32),
    }
    if stride != 1 or cin != cout:
        p["w_sc"] = 0.1 * jax.random.normal(ks[6], (cout, cin, 1, 1), jnp.float32)
        p["g_sc"] = 1.0 + 0.1 * jax.random.normal(ks[7], (cout,), jnp.float32)
        p["b_sc"] = 0.05 * jax.random.normal(ks[8], (cout,), jnp.float32)
    return p


# ----------------------------------- main ----------------------------------------
if __name__ == "__main__":
    key = jax.random.PRNGKey(0)
    kx, kp1, kp2 = jax.random.split(key, 3)

    # Tolerances account for bf16 matmul operands / bf16 stashes vs. the f32 reference.
    ATOL, RTOL = 5e-2, 5e-2

    # Config A: projection shortcut (stride=2, in_channels != out_channels)
    x_a = jax.random.normal(kx, (2, 4, 16, 16), jnp.float32)  # NCHW
    p_a = init_params(kp1, cin=4, cout=8, stride=2)
    out_a = resnet_block_forward(x_a, p_a, stride=2)
    jax.block_until_ready(out_a)
    ref_a = resnet_block_ref(x_a, p_a, stride=2)
    assert out_a.shape == (2, 8, 8, 8), out_a.shape
    err_a = float(jnp.max(jnp.abs(out_a.astype(jnp.float32) - ref_a)))
    assert jnp.allclose(out_a.astype(jnp.float32), ref_a, atol=ATOL, rtol=RTOL), (
        "config A mismatch, max abs err %.4f" % err_a)

    # Config B: identity shortcut (stride=1, in_channels == out_channels)
    x_b = jax.random.normal(kx, (2, 8, 16, 16), jnp.float32)  # NCHW
    p_b = init_params(kp2, cin=8, cout=8, stride=1)
    out_b = resnet_block_forward(x_b, p_b, stride=1)
    jax.block_until_ready(out_b)
    ref_b = resnet_block_ref(x_b, p_b, stride=1)
    assert out_b.shape == (2, 8, 16, 16), out_b.shape
    err_b = float(jnp.max(jnp.abs(out_b.astype(jnp.float32) - ref_b)))
    assert jnp.allclose(out_b.astype(jnp.float32), ref_b, atol=ATOL, rtol=RTOL), (
        "config B mismatch, max abs err %.4f" % err_b)

    print("KERNEL_OK")
</pallas_src>

<mosaic_0001>
module attributes {stable_mosaic.version = 11 : i64} {
  func.func @_taps_matmul_kernel(%arg0: i32, %arg1: memref<1x64x36xbf16, #tpu.memory_space<vmem>>, %arg2: memref<36x128xbf16, #tpu.memory_space<vmem>>, %arg3: memref<1x64x128xbf16, #tpu.memory_space<vmem>>, %arg4: memref<1x1x128xf32, #tpu.memory_space<vmem>>, %arg5: memref<1x1x128xf32, #tpu.memory_space<vmem>>) attributes {dimension_semantics = [#tpu.dimension_semantics<parallel>], iteration_bounds = array<i64: 2>, scalar_prefetch = 0 : i64, scratch_operands = 0 : i64, tpu.core_type = #tpu.core_type<tc>, window_params = [{transform_indices = @transform_0, window_bounds = array<i64: 1, 64, 36>}, {pipeline_mode = #tpu.pipeline_mode<synchronous>, transform_indices = @transform_1, window_bounds = array<i64: 36, 128>}, {transform_indices = @transform_2, window_bounds = array<i64: 1, 64, 128>}, {transform_indices = @transform_3, window_bounds = array<i64: 1, 1, 128>}, {transform_indices = @transform_4, window_bounds = array<i64: 1, 1, 128>}]} {
    %c0 = arith.constant 0 : index
    %c0_0 = arith.constant 0 : index
    %c0_1 = arith.constant 0 : index
    %0 = vector.load %arg1[%c0, %c0_0, %c0_1] : memref<1x64x36xbf16, #tpu.memory_space<vmem>>, vector<1x64x36xbf16>
    %1 = vector.shape_cast %0 : vector<1x64x36xbf16> to vector<64x36xbf16>
    %c0_2 = arith.constant 0 : index
    %c0_3 = arith.constant 0 : index
    %2 = vector.load %arg2[%c0_2, %c0_3] : memref<36x128xbf16, #tpu.memory_space<vmem>>, vector<36x128xbf16>
    %cst = arith.constant dense<0.000000e+00> : vector<64x128xf32>
    %3 = tpu.matmul %1, %2, %cst {dimension_numbers = #tpu.dot_dimension_numbers<[1], [0], [0], [1], [0, 0, 1, 1], [], []>} : vector<64x36xbf16>, vector<36x128xbf16>, vector<64x128xf32> -> vector<64x128xf32>
    %4 = arith.truncf %3 : vector<64x128xf32> to vector<64x128xbf16>
    %c0_4 = arith.constant 0 : index
    %c0_5 = arith.constant 0 : index
    %c0_6 = arith.constant 0 : index
    %5 = vector.load %arg3[%c0_4, %c0_5, %c0_6] : memref<1x64x128xbf16, #tpu.memory_space<vmem>>, vector<1x64x128xbf16>
    %6 = vector.shape_cast %5 : vector<1x64x128xbf16> to vector<64x128xbf16>
    %7 = vector.shape_cast %4 : vector<64x128xbf16> to vector<1x64x128xbf16>
    tpu.vector_store %arg3[%c0_4, %c0_5, %c0_6], %7 {strides = array<i32>} : memref<1x64x128xbf16, #tpu.memory_space<vmem>>, vector<1x64x128xbf16>,
    %cst_7 = arith.constant dense<0.000000e+00> : vector<128xf32>
    %8 = vector.multi_reduction <add>, %3, %cst_7 [0] : vector<64x128xf32> to vector<128xf32>
    %9 = vector.shape_cast %8 : vector<128xf32> to vector<1x128xf32>
    %c0_8 = arith.constant 0 : index
    %c0_9 = arith.constant 0 : index
    %c0_10 = arith.constant 0 : index
    %10 = vector.load %arg4[%c0_8, %c0_9, %c0_10] : memref<1x1x128xf32, #tpu.memory_space<vmem>>, vector<1x1x128xf32>
    %11 = vector.shape_cast %10 : vector<1x1x128xf32> to vector<1x128xf32>
    %12 = vector.shape_cast %9 : vector<1x128xf32> to vector<1x1x128xf32>
    tpu.vector_store %arg4[%c0_8, %c0_9, %c0_10], %12 {strides = array<i32>} : memref<1x1x128xf32, #tpu.memory_space<vmem>>, vector<1x1x128xf32>,
    %13 = arith.mulf %3, %3 : vector<64x128xf32>
    %cst_11 = arith.constant dense<0.000000e+00> : vector<128xf32>
    %14 = vector.multi_reduction <add>, %13, %cst_11 [0] : vector<64x128xf32> to vector<128xf32>
    %15 = vector.shape_cast %14 : vector<128xf32> to vector<1x128xf32>
    %c0_12 = arith.constant 0 : index
    %c0_13 = arith.constant 0 : index
    %c0_14 = arith.constant 0 : index
    %16 = vector.load %arg5[%c0_12, %c0_13, %c0_14] : memref<1x1x128xf32, #tpu.memory_space<vmem>>, vector<1x1x128xf32>
    %17 = vector.shape_cast %16 : vector<1x1x128xf32> to vector<1x128xf32>
    %18 = vector.shape_cast %15 : vector<1x128xf32> to vector<1x1x128xf32>
    tpu.vector_store %arg5[%c0_12, %c0_13, %c0_14], %18 {strides = array<i32>} : memref<1x1x128xf32, #tpu.memory_space<vmem>>, vector<1x1x128xf32>,
    return
  }
  func.func @transform_0(%arg0: i32) -> (i32, i32, i32) {
    %c0_i32 = arith.constant 0 : i32
    %c0_i32_0 = arith.constant 0 : i32
    %c0_i32_1 = arith.constant 0 : i32
    return %arg0, %c0_i32, %c0_i32_0 : i32, i32, i32
  }
  func.func @transform_1(%arg0: i32) -> (i32, i32) {
    %c0_i32 = arith.constant 0 : i32
    %c0_i32_0 = arith.constant 0 : i32
    %c0_i32_1 = arith.constant 0 : i32
    return %c0_i32, %c0_i32_0 : i32, i32
  }
  func.func @transform_2(%arg0: i32) -> (i32, i32, i32) {
    %c0_i32 = arith.constant 0 : i32
    %c0_i32_0 = arith.constant 0 : i32
    %c0_i32_1 = arith.constant 0 : i32
    return %arg0, %c0_i32, %c0_i32_0 : i32, i32, i32
  }
  func.func @transform_3(%arg0: i32) -> (i32, i32, i32) {
    %c0_i32 = arith.constant 0 : i32
    %c0_i32_0 = arith.constant 0 : i32
    %c0_i32_1 = arith.constant 0 : i32
    return %arg0, %c0_i32, %c0_i32_0 : i32, i32, i32
  }
  func.func @transform_4(%arg0: i32) -> (i32, i32, i32) {
    %c0_i32 = arith.constant 0 : i32
    %c0_i32_0 = arith.constant 0 : i32
    %c0_i32_1 = arith.constant 0 : i32
    return %arg0, %c0_i32, %c0_i32_0 : i32, i32, i32
  }
}

</mosaic_0001>

<bundles_post_ra>
// kernel: tpu_custom_call.1
= control target key start
LH: loop header
LB: loop body
LE: loop exit
PB: predicated region body
PF: predicated region fallthrough
CT: control target
= control target key end

     0   :  { %10 = vsyncpa [#allocation3], 0  ;;  %s1082_s0 = inlined_call_operand.vmem [shape: bf16[2,64,36], index: 0, kind: input, shape index: {}]   ;;  %s1083_s1 = inlined_call_operand.vmem [shape: bf16[36,128], index: 1, kind: input, shape index: {}]   ;;  %s1084_s2 = inlined_call_operand.hbm [shape: bf16[2,64,128], index: 2, kind: output, shape index: {0}]   ;;  %s1085_s3 = inlined_call_operand.hbm [shape: f32[2,1,128], index: 3, kind: output, shape index: {1}]   ;;  %s1086_s4 = inlined_call_operand.hbm [shape: f32[2,1,128], index: 4, kind: output, shape index: {2}]  }
   0x1   :  { %12 = vsyncpa [#allocation3 + $0x1], 0 }
   0x2   :  { %13 = vsyncpa [#allocation5], 0 }
   0x3   :  { %15 = vsyncpa [#allocation5 + $0x1], 0  ;;  %s889_s15 = smov 0   ;;  %s891_s16 = smov 0  }
   0x4   :  { %s893_s17 = smov 0   ;;  %s895_s18 = smov 0  }
   0x5 LB: > { %s910_s19 = sadd.s32 4294967295, %s857_s18   ;;  %s582_s20 = sadd.s32 4294967294, %s857_s18   ;;  %s857_s18 = sphi %s895_s18, %s1092_s18   ;;  %s853_s17 = sphi %s893_s17, %s1091_s17   ;;  %s849_s16 = sphi %s891_s16, %s1090_s16   ;;  %s845_s15 = sphi %s889_s15, %s1089_s15  }
   0x6   : > { %s914_s21 = sadd.s32 1, %s857_s18   ;;  %s75_s22 = sadd.s32 1, %s853_s17 }
   0x7   : > { %s72_s23 = ssub.s32 %s857_s18, %s914_s21  ;;  %p85_p0 = scmp.ne.s32.totalorder %s853_s17, %s849_s16 }
   0x8   : > { %p73_p1 = scmp.eq.s32.totalorder %s72_s23, 0  ;;  %p86_p2 = scmp.eq.s32.totalorder %s910_s19, 1 }
   0x9   : > { %p91_p3 = scmp.ne.s32.totalorder %s849_s16, %s845_s15  ;;  %p92_p4 = scmp.eq.s32.totalorder %s582_s20, 1 }
   0xa   : > { %s927_s24 = scalar_select %p73_p1, %s853_s17, %s75_s22  }
   0xb   : > { %p929_p5 = por %p86_p2, %p85_p0  ;;  %p933_p6 = por %p92_p4, %p91_p3 }
   0xc   : > { %p585_p7 = scmp.ge.s32.totalorder %s857_s18, 1  ;;  %p173_p8 = scmp.lt.s32.totalorder %s857_s18, 3 }
   0xe   : > { %p174_p9 = pnand %p585_p7, %p173_p8 }
   0xf   : > { %v728_v0 = vld [vmem:[%s1083_s1] sm:$0xff] (!%p174_p9)   ;;  %v729_v1 = vld [vmem:[%s1083_s1 + $0x8] sm:$0xff] (!%p174_p9)   ;;  %p207_p10 = scmp.lt.s32.totalorder (!%p174_p9), %s910_s19, 1  ;;  %v730_v2 = vld [vmem:[%s1083_s1 + $0x10] ss:$0 sps:$4 sm:$0x33] (!%p174_p9)  }
  0x10   : > { %177 = sbr.rel (%p174_p9) target bundleno = 317 (0x13d), region = 28  ;;  %655 = vmatprep.subr.bf16.mxu0 (!%p174_p9), %v728_v0  ;;  %669 = vmatprep.subr.bf16.mxu1 (!%p174_p9), %v728_v0  ;;  %vm274_vm0 = vcmask (!%p174_p9), 1041408   ;;  %vm261_vm1 = vcmask (!%p174_p9), 293888   ;;  %s954_s12 = sand.u32 (!%p174_p9), 1, %s849_s16  }
  0x11   : > { %656 = vmatpush3.bf16.msra.mxu0 (!%p174_p9), %v728_v0  ;;  %672 = vmatpush3.bf16.msra.mxu1 (!%p174_p9), %v728_v0  ;;  %v276_v4 = vsel (!%p174_p9), %vm274_vm0, %v730_v2, 0  ;;  %s586_s13 = sshll.u32 (!%p174_p9), %s954_s12, 5  ;;  %s624_s23 = sshll.u32 (!%p174_p9), %s910_s19, 9 }
  0x12   : > { %657 = vmatprep.subr.bf16.mxu0 (!%p174_p9), %v729_v1  ;;  %670 = vmatprep.subr.bf16.mxu1 (!%p174_p9), %v729_v1  ;;  %s194_s14 = scalar_lea.vmem (!%p174_p9), [#allocation2], %s586_s13  ;;  %s966_s29 = scalar_lea.hbm (!%p174_p9), %s1084_s2, %s624_s23 }
  0x13   : > { %s441_s22 = sshll.u32 (!%p174_p9), %s194_s14, 4  ;;  %s420_s30 = scalar_lea.sflag (!%p174_p9), [#allocation3], %s954_s12  ;;  %s960_s22 = int_to_ptr.vmem [resolvable:$true] %s441_s22 }
  0x14   : > { %s859_s6 = smov (!%p174_p9), [#allocation2]  }
  0x15   : > { %658 = vmatpush3.bf16.msra.mxu0 (!%p174_p9), %v729_v1  ;;  %673 = vmatpush3.bf16.msra.mxu1 (!%p174_p9), %v729_v1  ;;  %s739_s7 = sshll.u32 (!%p174_p9), %s859_s6, 4  ;;  %s740_s7 = int_to_ptr.vmem [resolvable:$false] %s739_s7 }
  0x16   : > { %675 = vmatprep.subr.msk.bf16.mxu0 (!%p174_p9), %vm274_vm0, %v730_v2  ;;  %676 = vmatprep.subr.msk.bf16.mxu1 (!%p174_p9), %vm274_vm0, %v730_v2  ;;  %p742_p0 = scmp.lt.s32.totalorder (!%p174_p9), %s960_s22, %s740_s7 }
  0x17   : > { %s208_s5 = scalar_select %p207_p10, %s910_s19, 1 }
  0x19   : > { %s615_s8 = sshll.u32 %s208_s5, 5  ;;  %660 = vmatpush3.bf16.msra.mxu0 %v276_v4  ;;  %674 = vmatpush3.bf16.msra.mxu1 %v276_v4  ;;  %s735_s5 = scalar_lea.vmem %s960_s22, 512 }
  0x1a   : > { %s211_s11 = scalar_lea.vmem %s1082_s0, %s615_s8  ;;  %p736_p11 = scmp.ne.s32.totalorder %s960_s22, %s735_s5 }
  0x1b   : > { %v731_v3 = vld [vmem:[%s211_s11] sm:$0xff]   ;;  %v732_v5 = vld [vmem:[%s211_s11 + $0x8] sm:$0xff]   ;;  %v733_v6 = vld [vmem:[%s211_s11 + $0x10] sm:$0xff]   ;;  %s741_s8 = scalar_lea.vmem %s740_s7, 1024 }
  0x1c   : > { %661 = vmatprep.mubr.msk.bf16.mxu0 %vm261_vm1, %v731_v3  ;;  %v734_v7 = vld [vmem:[%s211_s11 + $0x18] sm:$0xff]   ;;  %665 = vmatprep.mubr.msk.bf16.mxu1 %vm261_vm1, %v733_v6  ;;  %p737_p12 = pnand %p736_p11, %p929_p5  ;;  %p743_p1 = scmp.lt.s32.totalorder %s741_s8, %s735_s5 }
  0x1d   : > { %662 = vmatmul.mubr.msk.bf16.vlgmr.msra.gmra.mrb[0].mxu0 %vm261_vm1, %v732_v5  ;;  %666 = vmatmul.mubr.msk.bf16.vlgmr.msra.gmra.mrb[0].mxu1 %vm261_vm1, %v734_v7 }
  0x1e   : > { %p738_p13 = pneg %p737_p12  ;;  %p744_p2 = por %p743_p1, %p742_p0 }
  0x20   : > { %p745_p3 = pnand %p744_p2, %p738_p13 }
  0xf0   : > { %v663_v8 = vpop.f32.mrb[0].mxu0  ;;  %v957_v9 = vpop.f32.mrb[0].mxu1 }
  0xf1   : > { %v312_v10 = vpop.f32.mrb[1].mxu0  ;;  %v328_v11 = vpop.f32.mrb[1].mxu1  ;;  %v399_v23 = vmul.f32 %v663_v8, %v663_v8 }
  0xf2   : > { %v664_v12 = vpop.f32.mrb[2].mxu0  ;;  %v668_v13 = vpop.f32.mrb[2].mxu1  ;;  %v397_v14 = vmul.f32 %v312_v10, %v312_v10 }
  0xf3   : > { %v633_v15 = vpack.c.bf16 %v664_v12, %v663_v8  ;;  %v315_v16 = vpop.f32.mrb[3].mxu0  ;;  %v643_v17 = vpack.c.bf16 %v668_v13, %v957_v9  ;;  %v331_v18 = vpop.f32.mrb[3].mxu1 }
  0xf4   : > { %v628_v19 = vpack.c.bf16 %v315_v16, %v312_v10  ;;  %v383_v20 = vadd.f32 %v315_v16, %v312_v10  ;;  %v398_v21 = vmul.f32 %v315_v16, %v315_v16  ;;  %v638_v22 = vpack.c.bf16 %v331_v18, %v328_v11 }
  0xf5   : > { %645 = vst [vmem:[%s194_s14 + $0x8] sm:$0xff] %v633_v15   ;;  %647 = vst [vmem:[%s194_s14 + $0x18] sm:$0xff] %v643_v17  }
  0xf6   : > { %629 = vst [vmem:[%s194_s14] sm:$0xff] %v628_v19   ;;  %v384_v24 = vadd.f32 %v663_v8, %v383_v20  ;;  %v405_v25 = vadd.f32 %v398_v21, %v397_v14  ;;  %646 = vst [vmem:[%s194_s14 + $0x10] sm:$0xff] %v638_v22  }
  0xf7   : > { %748 = shalt.err (!%p745_p3)
}
  0xf8   : > { %s749_s9 = scalar_lea.hbm %s966_s29, 512  ;;  %s753_s13 = scalar_lea.hbm %s1084_s2, 1024 }
  0xf9   : > { %p750_p4 = scmp.ne.s32.totalorder %s966_s29, %s749_s9  ;;  %p754_p9 = scmp.lt.u32.totalorder %s966_s29, %s1084_s2 }
  0xfa   : > { %p755_p10 = scmp.lt.u32.totalorder %s753_s13, %s749_s9  ;;  %p757_p12 = scmp.lt.u32.totalorder %s749_s9, %s966_s29 }
  0xfb   : > { %p751_p7 = pnand %p750_p4, %p929_p5 }
  0xfc   : > { %p756_p11 = por %p755_p10, %p754_p9 }
  0xfd   : > { %p752_p8 = pneg %p751_p7 }
  0xfe   : > { %p758_p13 = por %p757_p12, %p756_p11 }
 0x100   : > { %p759_p0 = pnand %p758_p13, %p752_p8 }
 0x102   : > { %762 = shalt.err (!%p759_p0)
}
 0x103   : > { %s860_s27 = smov 64   ;;  %s861_s28 = smov 4   ;;  %v400_v26 = vmul.f32 %v664_v12, %v664_v12  ;;  %v406_v27 = vadd.f32 %v405_v25, %v399_v23  ;;  %v385_v28 = vadd.f32 %v664_v12, %v384_v24  ;;  %v401_v29 = vmul.f32 %v328_v11, %v328_v11 }
 0x104   : > { %677 = dma.vmem_to_hbm [thread:$0]  (%p929_p5), %s960_s22, 512, %s966_s29, %s420_s30, %s860_s27, %s860_s27, %s861_s28   ;;  %v402_v34 = vmul.f32 %v331_v18, %v331_v18  ;;  %v403_v35 = vmul.f32 %v957_v9, %v957_v9  ;;  %v404_v38 = vmul.f32 %v668_v13, %v668_v13 }
 0x105   : > { %v386_v30 = vadd.f32 %v385_v28, %v328_v11  ;;  %v407_v31 = vadd.f32 %v406_v27, %v400_v26  ;;  %s424_s22 = sand.u32 1, %s910_s19   ;;  %s611_s29 = sshll.u32 %s910_s19, 4 }
 0x106   : > { %s200_s30 = scalar_lea.vmem [#allocation4], %s954_s12  ;;  %s206_s6 = scalar_lea.vmem [#allocation6], %s954_s12 }
 0x107   : > { %v408_v32 = vadd.f32 %v407_v31, %v401_v29  ;;  %v387_v33 = vadd.f32 %v386_v30, %v331_v18  ;;  %s457_s5 = sshll.u32 %s200_s30, 4  ;;  %s470_s7 = sshll.u32 %s206_s6, 4  ;;  %s1006_s5 = int_to_ptr.vmem [resolvable:$true] %s457_s5  ;;  %s1013_s7 = int_to_ptr.vmem [resolvable:$true] %s470_s7 }
 0x108   : > { %s1004_s10 = scalar_lea.hbm %s1085_s3, %s611_s29  ;;  %s1011_s13 = scalar_lea.hbm %s1086_s4, %s611_s29 }
 0x109   : > { %v388_v36 = vadd.f32 %v957_v9, %v387_v33  ;;  %v409_v37 = vadd.f32 %v408_v32, %v402_v34  ;;  %s1015_s14 = scalar_lea.sflag [#allocation5], %s424_s22  ;;  %s763_s23 = scalar_lea.vmem %s1006_s5, 16 }
 0x10a   : > { %p764_p1 = scmp.ne.s32.totalorder %s1006_s5, %s763_s23  ;;  %s862_s27 = smov [#allocation4]  }
 0x10b   : > { %v389_v39 = vadd.f32 %v668_v13, %v388_v36  ;;  %v410_v40 = vadd.f32 %v409_v37, %v403_v35  ;;  %s767_s28 = sshll.u32 %s862_s27, 4  ;;  %s768_s28 = int_to_ptr.vmem [resolvable:$false] %s767_s28 }
 0x10c   : > { %p765_p2 = pnand %p764_p1, %p929_p5  ;;  %s769_s8 = scalar_lea.vmem %s768_s28, 32 }
 0x10d   : > { %v390_v41 = vrot.slane %v389_v39, 4  ;;  %v411_v42 = vadd.f32 %v410_v40, %v404_v38  ;;  %p770_p4 = scmp.lt.s32.totalorder %s1006_s5, %s768_s28  ;;  %p771_p7 = scmp.lt.s32.totalorder %s769_s8, %s763_s23 }
 0x10e   : > { %p766_p3 = pneg %p765_p2 }
 0x10f   : > { %v391_v43 = vadd.f32 %v390_v41, %v389_v39  ;;  %v412_v44 = vrot.slane %v411_v42, 4  ;;  %p772_p8 = por %p771_p7, %p770_p4 }
 0x111   : > { %v413_v45 = vadd.f32 %v412_v44, %v411_v42  ;;  %v392_v46 = vrot.slane %v391_v43, 2  ;;  %p773_p9 = pnand %p772_p8, %p766_p3 }
 0x113   : > { %v393_v47 = vadd.f32 %v392_v46, %v391_v43  ;;  %v414_v48 = vrot.slane %v413_v45, 2 }
 0x115   : > { %v394_v49 = vrot.slane %v393_v47, 1  ;;  %v415_v50 = vadd.f32 %v414_v48, %v413_v45 }
 0x117   : > { %v395_v51 = vadd.f32 %v394_v49, %v393_v47  ;;  %v416_v52 = vrot.slane %v415_v50, 1 }
 0x119   : > { %396 = vst [vmem:[%s200_s30] sm:$0x1] %v395_v51  ;;  %v417_v53 = vadd.f32 %v416_v52, %v415_v50 }
 0x11a   : > { %776 = shalt.err (!%p773_p9)
}
 0x11b   : > { %s777_s22 = scalar_lea.hbm %s1004_s10, 16  ;;  %s781_s9 = scalar_lea.hbm %s1085_s3, 32 }
 0x11c   : > { %p778_p10 = scmp.ne.s32.totalorder %s1004_s10, %s777_s22  ;;  %p782_p13 = scmp.lt.u32.totalorder %s1004_s10, %s1085_s3 }
 0x11d   : > { %p783_p0 = scmp.lt.u32.totalorder %s781_s9, %s777_s22  ;;  %p785_p2 = scmp.lt.u32.totalorder %s777_s22, %s1004_s10 }
 0x11e   : > { %p779_p11 = pnand %p778_p10, %p929_p5 }
 0x11f   : > { %p784_p1 = por %p783_p0, %p782_p13 }
 0x120   : > { %p780_p12 = pneg %p779_p11 }
 0x121   : > { %p786_p3 = por %p785_p2, %p784_p1 }
 0x123   : > { %p787_p4 = pnand %p786_p3, %p780_p12 }
 0x125   : > { %790 = shalt.err (!%p787_p4)
}
 0x126   : > { %678 = dma.vmem_to_hbm [thread:$0]  (%p929_p5), %s1006_s5, 16, %s1004_s10, %s1015_s14   ;;  %418 = vst [vmem:[%s206_s6] sm:$0x1] %v417_v53 }
 0x127   : > { %s791_s23 = scalar_lea.vmem %s1013_s7, 16  ;;  %s863_s27 = smov [#allocation6]  }
 0x128   : > { %p792_p7 = scmp.ne.s32.totalorder %s1013_s7, %s791_s23  ;;  %s795_s28 = sshll.u32 %s863_s27, 4  ;;  %s796_s28 = int_to_ptr.vmem [resolvable:$false] %s795_s28 }
 0x129   : > { %s797_s8 = scalar_lea.vmem %s796_s28, 32  ;;  %p798_p10 = scmp.lt.s32.totalorder %s1013_s7, %s796_s28 }
 0x12a   : > { %p793_p8 = pnand %p792_p7, %p929_p5  ;;  %p799_p11 = scmp.lt.s32.totalorder %s797_s8, %s791_s23 }
 0x12c   : > { %p794_p9 = pneg %p793_p8  ;;  %p800_p12 = por %p799_p11, %p798_p10 }
 0x12e   : > { %p801_p13 = pnand %p800_p12, %p794_p9 }
 0x130   : > { %804 = shalt.err (!%p801_p13)
}
 0x131   : > { %s805_s12 = scalar_lea.hbm %s1011_s13, 16  ;;  %s809_s10 = scalar_lea.hbm %s1086_s4, 32 }
 0x132   : > { %p806_p0 = scmp.ne.s32.totalorder %s1011_s13, %s805_s12  ;;  %p810_p3 = scmp.lt.u32.totalorder %s1011_s13, %s1086_s4 }
 0x133   : > { %p811_p4 = scmp.lt.u32.totalorder %s809_s10, %s805_s12  ;;  %p813_p8 = scmp.lt.u32.totalorder %s805_s12, %s1011_s13 }
 0x134   : > { %p807_p1 = pnand %p806_p0, %p929_p5 }
 0x135   : > { %p812_p7 = por %p811_p4, %p810_p3 }
 0x136   : > { %p808_p2 = pneg %p807_p1 }
 0x137   : > { %p814_p9 = por %p813_p8, %p812_p7 }
 0x139   : > { %p815_p10 = pnand %p814_p9, %p808_p2 }
 0x13b   : > { %818 = shalt.err (!%p815_p10)
}
 0x13c   : > { %679 = dma.vmem_to_hbm [thread:$0]  (%p929_p5), %s1013_s7, 16, %s1011_s13, %s1015_s14  }
 0x13d PF: > { %p693_p11 = scmp.ge.s32.totalorder %s857_s18, 2  ;;  %s482_s30 = sand.u32 1, %s845_s15  }
 0x13e   : > { %s483_s9 = scalar_lea.sflag [#allocation3], %s482_s30 }
 0x13f   : > { %p684_p12 = pnand %p693_p11, %p933_p6 }
 0x141   : > { %836 = dma.done.wait (!%p684_p12), %s483_s9, 512  }
 0x142   : > { %838 = vsyncadd (!%p684_p12), %s483_s9, 4294966784  ;;  %s491_s19 = sand.u32 1, %s582_s20  }
 0x143   : > { %s492_s11 = scalar_lea.sflag [#allocation5], %s491_s19 }
 0x144   : > { %840 = dma.done.wait (!%p684_p12), %s492_s11, 32  }
 0x145   : > { %842 = vsyncadd (!%p684_p12), %s492_s11, 4294967264  ;;  %p18_p5 = scmp.ge.s32.totalorder %s914_s21, 4   ;;  %s1089_s15 = smov %s849_s16 }
 0x146   : > { %s1090_s16 = smov %s853_s17  ;;  %s1091_s17 = smov %s927_s24 }
 0x147   : > { %s1092_s18 = smov %s914_s21  ;;  %20 = sbr.rel (!%p18_p5) target bundleno = 5 (0x5), region = 95 }
 0x14e   :  { %504 = vsyncpa [#allocation3], 1 }
 0x14f   :  { %506 = vsyncpa [#allocation3 + $0x1], 1 }
 0x150   :  { %507 = vsyncpa [#allocation5], 1 }
 0x151   :  { %509 = vsyncpa [#allocation5 + $0x1], 1 }

</bundles_post_ra>
